<compile_context>
chip_gen: v7x
topology: tpu7x:2x2x1
jax: 0.10.0
libtpu: 0.0.40
codegen_flags: <defaults>
</compile_context>

<pallas_src>
import jax
import jax.numpy as jnp
from jax.experimental import pallas as pl
from jax.experimental.pallas import tpu as pltpu


# ------------------------------ Pallas kernel --------------------------------

_BODY = 8  # sublane-aligned offset of the image body inside the padded scratch


def encoder_fused_kernel(x_ref, w1_ref, s1_ref, b1_ref,
                         w2_ref, s2_ref, b2_ref,
                         wd_ref, sd_ref, bd_ref,
                         h_ref, d_ref,
                         pad_ref):
    """Fused conv3x3 -> conv3x3 -> down(2x2,s2), folded BN + LReLU(0.1).

    x_ref : (Nb, H, W*C)          Nb images, channels merged into lanes
    w1/w2 : (3*W*C, W*C)          block-banded 3x3 conv weights (mxu dtype)
    wd    : (2*W*C, Wo*2C)        block-banded 2x2 stride-2 conv weights
    s*/b* : (1, lanes)            per-output-lane folded BN scale / shift (f32)
    h_ref : (Nb, H, W*C)          conv-block output
    d_ref : (Nb, Ho, Wo*2C)       down-block output
    pad_ref: VMEM (Nb, H+16, W*C) vertically padded activations; body at
                                  sublane offset 8 so bulk stores are aligned.
    """
    Nb, H, WC = x_ref.shape
    Ho = H // 2
    WC2 = d_ref.shape[-1]
    M = Nb * H
    mxu_dtype = w1_ref.dtype

    def conv3x3(w_ref, s_ref, b_ref):
        # One banded matmul: (Nb*H, 3*WC) @ (3*WC, WC).  Horizontal taps and
        # horizontal zero-padding live inside the band; only the 1-row
        # vertical halo comes from pad_ref.
        patches = jnp.concatenate(
            [pad_ref[:, pl.ds(_BODY - 1 + ky, H), :].reshape(M, WC)
             for ky in range(3)], axis=-1)                       # (M, 3*WC)
        y = jnp.dot(patches.astype(mxu_dtype), w_ref[...],
                    preferred_element_type=jnp.float32)          # (M, WC) f32
        y = y * s_ref[...] + b_ref[...]
        return jnp.where(y >= 0.0, y, 0.1 * y)                   # LeakyReLU(0.1)

    # Zero the vertical halo.  The actual halo rows are _BODY-1 and _BODY+H,
    # but zeroing whole 8-row sublane tiles keeps both stores unmasked.
    zeros8 = jnp.zeros((Nb, 8, WC), jnp.float32)
    pad_ref[:, pl.ds(0, 8), :] = zeros8
    pad_ref[:, pl.ds(H + 8, 8), :] = zeros8

    # ---- conv block: two (conv -> BN -> LReLU); intermediate stays in VMEM
    pad_ref[:, pl.ds(_BODY, H), :] = x_ref[...].astype(jnp.float32)   # aligned
    h1 = conv3x3(w1_ref, s1_ref, b1_ref)                              # (M, WC)
    pad_ref[:, pl.ds(_BODY, H), :] = h1.reshape(Nb, H, WC)            # aligned
    h2 = conv3x3(w2_ref, s2_ref, b2_ref)                              # (M, WC)
    h_ref[...] = h2.reshape(Nb, H, WC).astype(h_ref.dtype)            # lane-dense

    # ---- down block: the stride-2 row-pair gather is a row-major reshape
    # (H even, so pairs never straddle an image boundary).
    pd = h2.reshape(Nb * Ho, 2 * WC)                                  # (ky, w, c)
    yd = jnp.dot(pd.astype(mxu_dtype), wd_ref[...],
                 preferred_element_type=jnp.float32)                  # (Nb*Ho, WC2)
    yd = yd * sd_ref[...] + bd_ref[...]
    yd = jnp.where(yd >= 0.0, yd, 0.1 * yd)
    d_ref[...] = yd.reshape(Nb, Ho, WC2).astype(d_ref.dtype)


# --------------------------- banded weight builders ---------------------------

def _band_weights_3x3(w_hwio, W):
    """(3,3,Cin,Cout) -> (3*W*Cin, W*Cout) block-banded matrix.

    Row index = ky*W*Cin + w_in*Cin + c_in ; col index = w_out*Cout + c_out.
    Horizontal zero padding (padding=1) is implicit in the band structure.
    """
    kH, kW, Cin, Cout = w_hwio.shape
    wi = jnp.arange(W)[:, None]                     # input column
    wo = jnp.arange(W)[None, :]                     # output column
    kx = wi - wo + 1                                # tap index, valid in [0,kW)
    valid = (kx >= 0) & (kx < kW)
    g = w_hwio[:, jnp.clip(kx, 0, kW - 1)]          # (kH, W, W, Cin, Cout)
    g = g * valid[None, :, :, None, None].astype(w_hwio.dtype)
    return jnp.transpose(g, (0, 1, 3, 2, 4)).reshape(kH * W * Cin, W * Cout)


def _band_weights_2x2_s2(w_hwio, W):
    """(2,2,Cin,Cout) -> (2*W*Cin, (W//2)*Cout) banded matrix, stride 2."""
    kH, kW, Cin, Cout = w_hwio.shape
    Wo = W // 2
    wi = jnp.arange(W)[:, None]
    wo = jnp.arange(Wo)[None, :]
    kx = wi - 2 * wo
    valid = (kx >= 0) & (kx < kW)
    g = w_hwio[:, jnp.clip(kx, 0, kW - 1)]          # (kH, W, Wo, Cin, Cout)
    g = g * valid[None, :, :, None, None].astype(w_hwio.dtype)
    return jnp.transpose(g, (0, 1, 3, 2, 4)).reshape(kH * W * Cin, Wo * Cout)


# --------------------------------- wrappers ------------------------------------

def _pick_images_per_program(N, H, target_rows=256):
    """Largest divisor Nb of N with Nb*H <= target_rows (>=1).

    Note for v7x: with large N, cap Nb at N//2 so the grid keeps >=2 programs
    and both TensorCores stay busy; at small N the dominant win is raising M.
    """
    nb = 1
    for cand in range(1, N + 1):
        if N % cand == 0 and cand * H <= target_rows:
            nb = cand
    return nb


def encoder_forward_lane(x_lane, params, *, mxu_dtype=jnp.bfloat16):
    """Layout-native entry point.

    x_lane: (N, H, W*C) with lane index = w*C + c.
    Returns (h_lane (N, H, W*C), d_lane (N, H//2, (W//2)*2C)).
    Lane-dense (W*C and (W//2)*2C multiples of 128) gives unmasked stores.
    """
    N, H, WC = x_lane.shape
    Cin = params["w1"].shape[2]
    C2 = params["wd"].shape[3]
    W = WC // Cin
    assert W * Cin == WC
    assert H % 2 == 0 and W % 2 == 0, "stride-2 down conv assumes even H and W"
    Ho, Wo = H // 2, W // 2
    WC2 = Wo * C2

    Nb = _pick_images_per_program(N, H)
    n_prog = N // Nb

    # Fold conv weights into block-banded matmul weights (cast to MXU dtype);
    # tile BN scale/shift across W so the epilogue is per-lane (done once,
    # outside the kernel).
    w1b = _band_weights_3x3(params["w1"], W).astype(mxu_dtype)   # (3*WC, WC)
    w2b = _band_weights_3x3(params["w2"], W).astype(mxu_dtype)   # (3*WC, WC)
    wdb = _band_weights_2x2_s2(params["wd"], W).astype(mxu_dtype)  # (2*WC, WC2)
    s1 = jnp.tile(params["s1"], W).reshape(1, WC).astype(jnp.float32)
    b1 = jnp.tile(params["b1"], W).reshape(1, WC).astype(jnp.float32)
    s2 = jnp.tile(params["s2"], W).reshape(1, WC).astype(jnp.float32)
    b2 = jnp.tile(params["b2"], W).reshape(1, WC).astype(jnp.float32)
    sd = jnp.tile(params["sd"], Wo).reshape(1, WC2).astype(jnp.float32)
    bd = jnp.tile(params["bd"], Wo).reshape(1, WC2).astype(jnp.float32)

    full = lambda shape: pl.BlockSpec(shape, lambda n: (0, 0))

    itemsize = jnp.dtype(x_lane.dtype).itemsize
    w_itemsize = jnp.dtype(mxu_dtype).itemsize
    flops = int(2 * 2 * (N * H) * (3 * WC) * WC            # two 3x3 convs
                + 2 * (N * Ho) * (2 * WC) * WC2)           # down conv
    bytes_accessed = int(
        N * H * WC * itemsize * 2                          # x in, h out
        + N * Ho * WC2 * itemsize                          # d out
        + (w1b.size + w2b.size + wdb.size) * w_itemsize
        + (s1.size + b1.size + s2.size + b2.size + sd.size + bd.size) * 4)
    cost = pl.CostEstimate(flops=flops, transcendentals=0,
                           bytes_accessed=bytes_accessed)

    h_lane, d_lane = pl.pallas_call(
        encoder_fused_kernel,
        grid=(n_prog,),
        in_specs=[
            pl.BlockSpec((Nb, H, WC), lambda n: (n, 0, 0)),     # x (Nb images)
            full(w1b.shape), full((1, WC)), full((1, WC)),
            full(w2b.shape), full((1, WC)), full((1, WC)),
            full(wdb.shape), full((1, WC2)), full((1, WC2)),
        ],
        out_specs=[
            pl.BlockSpec((Nb, H, WC), lambda n: (n, 0, 0)),
            pl.BlockSpec((Nb, Ho, WC2), lambda n: (n, 0, 0)),
        ],
        out_shape=[
            jax.ShapeDtypeStruct((N, H, WC), x_lane.dtype),
            jax.ShapeDtypeStruct((N, Ho, WC2), x_lane.dtype),
        ],
        scratch_shapes=[
            # vertically padded activations; body at sublane offset 8
            pltpu.VMEM((Nb, H + 16, WC), jnp.float32),
        ],
        compiler_params=pltpu.CompilerParams(
            dimension_semantics=("parallel",)),                 # megacore on v7x
        cost_estimate=cost,
    )(x_lane, w1b, s1, b1, w2b, s2, b2, wdb, sd, bd)
    return h_lane, d_lane


def encoder_forward(x_nchw, params, *, mxu_dtype=jnp.bfloat16):
    """NCHW-compatible wrapper matching the PyTorch module interface."""
    N, C, H, W = x_nchw.shape
    Ho, Wo = H // 2, W // 2
    C2 = 2 * C
    # NCHW -> (N, H, W*C): channels merged into the lane dimension.
    x_lane = jnp.transpose(x_nchw, (0, 2, 3, 1)).reshape(N, H, W * C)
    h_lane, d_lane = encoder_forward_lane(x_lane, params, mxu_dtype=mxu_dtype)
    h = jnp.transpose(h_lane.reshape(N, H, W, C), (0, 3, 1, 2))
    d = jnp.transpose(d_lane.reshape(N, Ho, Wo, C2), (0, 3, 1, 2))
    return h, d


# ---------------------- deterministic parameter setup -------------------------

def fold_bn(gamma, beta, running_mean, running_var, eps=1e-5):
    scale = gamma / jnp.sqrt(running_var + eps)
    shift = beta - running_mean * scale
    return scale, shift


def make_params(key, C):
    ks = jax.random.split(key, 16)

    def bn(k, c):
        k0, k1, k2, k3 = jax.random.split(k, 4)
        gamma = jax.random.uniform(k0, (c,), jnp.float32, 0.5, 1.5)
        beta = 0.1 * jax.random.normal(k1, (c,), jnp.float32)
        rmean = 0.1 * jax.random.normal(k2, (c,), jnp.float32)
        rvar = jax.random.uniform(k3, (c,), jnp.float32, 0.5, 1.5)
        return fold_bn(gamma, beta, rmean, rvar)

    # Conv weights generated in PyTorch OIHW layout, converted to HWIO.
    w1_oihw = 0.1 * jax.random.normal(ks[0], (C, C, 3, 3), jnp.float32)
    w2_oihw = 0.1 * jax.random.normal(ks[1], (C, C, 3, 3), jnp.float32)
    wd_oihw = 0.1 * jax.random.normal(ks[2], (2 * C, C, 2, 2), jnp.float32)
    s1, b1 = bn(ks[3], C)
    s2, b2 = bn(ks[4], C)
    sd, bd = bn(ks[5], 2 * C)
    return dict(
        w1=jnp.transpose(w1_oihw, (2, 3, 1, 0)),   # -> (3,3,Cin,Cout)
        w2=jnp.transpose(w2_oihw, (2, 3, 1, 0)),
        wd=jnp.transpose(wd_oihw, (2, 3, 1, 0)),   # -> (2,2,Cin,Cout)
        s1=s1, b1=b1, s2=s2, b2=b2, sd=sd, bd=bd,
    )


# ------------------------------- pure-JAX ref ----------------------------------

def ref_forward(x_nchw, params):
    x = jnp.transpose(x_nchw, (0, 2, 3, 1))

    def conv(x, w, stride, pad):
        return jax.lax.conv_general_dilated(
            x, w, (stride, stride), pad,
            dimension_numbers=("NHWC", "HWIO", "NHWC"))

    def lrelu(y):
        return jnp.where(y >= 0, y, 0.1 * y)

    h = lrelu(conv(x, params["w1"], 1, "SAME") * params["s1"] + params["b1"])
    h = lrelu(conv(h, params["w2"], 1, "SAME") * params["s2"] + params["b2"])
    d = lrelu(conv(h, params["wd"], 2, "VALID") * params["sd"] + params["bd"])
    return jnp.transpose(h, (0, 3, 1, 2)), jnp.transpose(d, (0, 3, 1, 2))


# ----------------------------------- main ---------------------------------------

if __name__ == "__main__":
    N, C, H, W = 2, 8, 16, 16            # out_c = 8 ; W*C = 128 (lane dense)
    key = jax.random.PRNGKey(0)
    kx, kp = jax.random.split(key)
    x = jax.random.normal(kx, (N, C, H, W), jnp.float32)
    params = make_params(kp, C)

    ref_x, ref_down = ref_forward(x, params)

    # 1) Exact-structure check: f32 MXU operands, tight tolerance.
    f_f32 = jax.jit(lambda a, p: encoder_forward(a, p, mxu_dtype=jnp.float32))
    out_x, out_down = f_f32(x, params)
    jax.block_until_ready((out_x, out_down))
    assert out_x.shape == (N, C, H, W)
    assert out_down.shape == (N, 2 * C, H // 2, W // 2)
    assert jnp.allclose(out_x, ref_x, atol=2e-4, rtol=2e-4)
    assert jnp.allclose(out_down, ref_down, atol=2e-4, rtol=2e-4)

    # 2) Performance-default path: bf16 MXU operands, f32 accumulate/epilogue.
    #    Looser tolerance only reflects bf16 operand rounding (structure already
    #    verified above against the f32 path).
    f_bf16 = jax.jit(encoder_forward)
    out_x_b, out_down_b = f_bf16(x, params)
    jax.block_until_ready((out_x_b, out_down_b))
    assert jnp.allclose(out_x_b, ref_x, atol=5e-2, rtol=5e-2)
    assert jnp.allclose(out_down_b, ref_down, atol=5e-2, rtol=5e-2)

    print("KERNEL_OK")
</pallas_src>

<mosaic_0001>
module attributes {stable_mosaic.version = 11 : i64} {
  func.func @encoder_fused_kernel(%arg0: i32, %arg1: memref<2x16x128xf32, #tpu.memory_space<vmem>>, %arg2: memref<384x128xf32, #tpu.memory_space<vmem>>, %arg3: memref<1x128xf32, #tpu.memory_space<vmem>>, %arg4: memref<1x128xf32, #tpu.memory_space<vmem>>, %arg5: memref<384x128xf32, #tpu.memory_space<vmem>>, %arg6: memref<1x128xf32, #tpu.memory_space<vmem>>, %arg7: memref<1x128xf32, #tpu.memory_space<vmem>>, %arg8: memref<256x128xf32, #tpu.memory_space<vmem>>, %arg9: memref<1x128xf32, #tpu.memory_space<vmem>>, %arg10: memref<1x128xf32, #tpu.memory_space<vmem>>, %arg11: memref<2x16x128xf32, #tpu.memory_space<vmem>>, %arg12: memref<2x8x128xf32, #tpu.memory_space<vmem>>, %arg13: memref<2x32x128xf32, #tpu.memory_space<vmem>>) attributes {dimension_semantics = [#tpu.dimension_semantics<parallel>], iteration_bounds = array<i64: 1>, scalar_prefetch = 0 : i64, scratch_operands = 1 : i64, tpu.core_type = #tpu.core_type<tc>, window_params = [{transform_indices = @transform_0, window_bounds = array<i64: 2, 16, 128>}, {pipeline_mode = #tpu.pipeline_mode<synchronous>, transform_indices = @transform_1, window_bounds = array<i64: 384, 128>}, {pipeline_mode = #tpu.pipeline_mode<synchronous>, transform_indices = @transform_2, window_bounds = array<i64: 1, 128>}, {pipeline_mode = #tpu.pipeline_mode<synchronous>, transform_indices = @transform_3, window_bounds = array<i64: 1, 128>}, {pipeline_mode = #tpu.pipeline_mode<synchronous>, transform_indices = @transform_4, window_bounds = array<i64: 384, 128>}, {pipeline_mode = #tpu.pipeline_mode<synchronous>, transform_indices = @transform_5, window_bounds = array<i64: 1, 128>}, {pipeline_mode = #tpu.pipeline_mode<synchronous>, transform_indices = @transform_6, window_bounds = array<i64: 1, 128>}, {pipeline_mode = #tpu.pipeline_mode<synchronous>, transform_indices = @transform_7, window_bounds = array<i64: 256, 128>}, {pipeline_mode = #tpu.pipeline_mode<synchronous>, transform_indices = @transform_8, window_bounds = array<i64: 1, 128>}, {pipeline_mode = #tpu.pipeline_mode<synchronous>, transform_indices = @transform_9, window_bounds = array<i64: 1, 128>}, {transform_indices = @transform_10, window_bounds = array<i64: 2, 16, 128>}, {transform_indices = @transform_11, window_bounds = array<i64: 2, 8, 128>}]} {
    %cst = arith.constant 0.000000e+00 : f32
    %0 = vector.broadcast %cst : f32 to vector<2x8x128xf32>
    %c0 = arith.constant 0 : index
    %c0_0 = arith.constant 0 : index
    %c0_1 = arith.constant 0 : index
    %1 = vector.load %arg13[%c0, %c0_0, %c0_1] : memref<2x32x128xf32, #tpu.memory_space<vmem>>, vector<2x8x128xf32>
    tpu.vector_store %arg13[%c0, %c0_0, %c0_1], %0 {strides = array<i32>} : memref<2x32x128xf32, #tpu.memory_space<vmem>>, vector<2x8x128xf32>,
    %c0_2 = arith.constant 0 : index
    %c24 = arith.constant 24 : index
    %c0_3 = arith.constant 0 : index
    %2 = vector.load %arg13[%c0_2, %c24, %c0_3] : memref<2x32x128xf32, #tpu.memory_space<vmem>>, vector<2x8x128xf32>
    tpu.vector_store %arg13[%c0_2, %c24, %c0_3], %0 {strides = array<i32>} : memref<2x32x128xf32, #tpu.memory_space<vmem>>, vector<2x8x128xf32>,
    %c0_4 = arith.constant 0 : index
    %c0_5 = arith.constant 0 : index
    %c0_6 = arith.constant 0 : index
    %3 = vector.load %arg1[%c0_4, %c0_5, %c0_6] : memref<2x16x128xf32, #tpu.memory_space<vmem>>, vector<2x16x128xf32>
    %c0_7 = arith.constant 0 : index
    %c8 = arith.constant 8 : index
    %c0_8 = arith.constant 0 : index
    %4 = vector.load %arg13[%c0_7, %c8, %c0_8] : memref<2x32x128xf32, #tpu.memory_space<vmem>>, vector<2x16x128xf32>
    tpu.vector_store %arg13[%c0_7, %c8, %c0_8], %3 {strides = array<i32>} : memref<2x32x128xf32, #tpu.memory_space<vmem>>, vector<2x16x128xf32>,
    %c0_9 = arith.constant 0 : index
    %c7 = arith.constant 7 : index
    %c0_10 = arith.constant 0 : index
    %5 = vector.load %arg13[%c0_9, %c7, %c0_10] : memref<2x32x128xf32, #tpu.memory_space<vmem>>, vector<2x16x128xf32>
    %6 = vector.shape_cast %5 : vector<2x16x128xf32> to vector<32x128xf32>
    %c0_11 = arith.constant 0 : index
    %c8_12 = arith.constant 8 : index
    %c0_13 = arith.constant 0 : index
    %7 = vector.load %arg13[%c0_11, %c8_12, %c0_13] : memref<2x32x128xf32, #tpu.memory_space<vmem>>, vector<2x16x128xf32>
    %8 = vector.shape_cast %7 : vector<2x16x128xf32> to vector<32x128xf32>
    %c0_14 = arith.constant 0 : index
    %c9 = arith.constant 9 : index
    %c0_15 = arith.constant 0 : index
    %9 = vector.load %arg13[%c0_14, %c9, %c0_15] : memref<2x32x128xf32, #tpu.memory_space<vmem>>, vector<2x16x128xf32>
    %10 = vector.shape_cast %9 : vector<2x16x128xf32> to vector<32x128xf32>
    %11 = tpu.concatenate %6, %8, %10 in 1 : vector<32x128xf32>, vector<32x128xf32>, vector<32x128xf32> -> vector<32x384xf32>
    %c0_16 = arith.constant 0 : index
    %c0_17 = arith.constant 0 : index
    %12 = vector.load %arg2[%c0_16, %c0_17] : memref<384x128xf32, #tpu.memory_space<vmem>>, vector<384x128xf32>
    %cst_18 = arith.constant dense<0.000000e+00> : vector<32x128xf32>
    %13 = tpu.matmul %11, %12, %cst_18 {dimension_numbers = #tpu.dot_dimension_numbers<[1], [0], [0], [1], [0, 0, 1, 1], [], []>} : vector<32x384xf32>, vector<384x128xf32>, vector<32x128xf32> -> vector<32x128xf32>
    %c0_19 = arith.constant 0 : index
    %c0_20 = arith.constant 0 : index
    %14 = vector.load %arg3[%c0_19, %c0_20] : memref<1x128xf32, #tpu.memory_space<vmem>>, vector<1x128xf32>
    %15 = vector.broadcast %14 : vector<1x128xf32> to vector<32x128xf32>
    %16 = arith.mulf %13, %15 : vector<32x128xf32>
    %c0_21 = arith.constant 0 : index
    %c0_22 = arith.constant 0 : index
    %17 = vector.load %arg4[%c0_21, %c0_22] : memref<1x128xf32, #tpu.memory_space<vmem>>, vector<1x128xf32>
    %18 = vector.broadcast %17 : vector<1x128xf32> to vector<32x128xf32>
    %19 = arith.addf %16, %18 : vector<32x128xf32>
    %cst_23 = arith.constant 0.000000e+00 : f32
    %20 = vector.broadcast %cst_23 : f32 to vector<32x128xf32>
    %21 = arith.cmpf oge, %19, %20 : vector<32x128xf32>
    %cst_24 = arith.constant 1.000000e-01 : f32
    %22 = vector.broadcast %cst_24 : f32 to vector<32x128xf32>
    %23 = arith.mulf %22, %19 : vector<32x128xf32>
    %24 = arith.select %21, %19, %23 : vector<32x128xi1>, vector<32x128xf32>
    %25 = vector.shape_cast %24 : vector<32x128xf32> to vector<2x16x128xf32>
    %c0_25 = arith.constant 0 : index
    %c8_26 = arith.constant 8 : index
    %c0_27 = arith.constant 0 : index
    %26 = vector.load %arg13[%c0_25, %c8_26, %c0_27] : memref<2x32x128xf32, #tpu.memory_space<vmem>>, vector<2x16x128xf32>
    tpu.vector_store %arg13[%c0_25, %c8_26, %c0_27], %25 {strides = array<i32>} : memref<2x32x128xf32, #tpu.memory_space<vmem>>, vector<2x16x128xf32>,
    %c0_28 = arith.constant 0 : index
    %c7_29 = arith.constant 7 : index
    %c0_30 = arith.constant 0 : index
    %27 = vector.load %arg13[%c0_28, %c7_29, %c0_30] : memref<2x32x128xf32, #tpu.memory_space<vmem>>, vector<2x16x128xf32>
    %28 = vector.shape_cast %27 : vector<2x16x128xf32> to vector<32x128xf32>
    %c0_31 = arith.constant 0 : index
    %c8_32 = arith.constant 8 : index
    %c0_33 = arith.constant 0 : index
    %29 = vector.load %arg13[%c0_31, %c8_32, %c0_33] : memref<2x32x128xf32, #tpu.memory_space<vmem>>, vector<2x16x128xf32>
    %30 = vector.shape_cast %29 : vector<2x16x128xf32> to vector<32x128xf32>
    %c0_34 = arith.constant 0 : index
    %c9_35 = arith.constant 9 : index
    %c0_36 = arith.constant 0 : index
    %31 = vector.load %arg13[%c0_34, %c9_35, %c0_36] : memref<2x32x128xf32, #tpu.memory_space<vmem>>, vector<2x16x128xf32>
    %32 = vector.shape_cast %31 : vector<2x16x128xf32> to vector<32x128xf32>
    %33 = tpu.concatenate %28, %30, %32 in 1 : vector<32x128xf32>, vector<32x128xf32>, vector<32x128xf32> -> vector<32x384xf32>
    %c0_37 = arith.constant 0 : index
    %c0_38 = arith.constant 0 : index
    %34 = vector.load %arg5[%c0_37, %c0_38] : memref<384x128xf32, #tpu.memory_space<vmem>>, vector<384x128xf32>
    %cst_39 = arith.constant dense<0.000000e+00> : vector<32x128xf32>
    %35 = tpu.matmul %33, %34, %cst_39 {dimension_numbers = #tpu.dot_dimension_numbers<[1], [0], [0], [1], [0, 0, 1, 1], [], []>} : vector<32x384xf32>, vector<384x128xf32>, vector<32x128xf32> -> vector<32x128xf32>
    %c0_40 = arith.constant 0 : index
    %c0_41 = arith.constant 0 : index
    %36 = vector.load %arg6[%c0_40, %c0_41] : memref<1x128xf32, #tpu.memory_space<vmem>>, vector<1x128xf32>
    %37 = vector.broadcast %36 : vector<1x128xf32> to vector<32x128xf32>
    %38 = arith.mulf %35, %37 : vector<32x128xf32>
    %c0_42 = arith.constant 0 : index
    %c0_43 = arith.constant 0 : index
    %39 = vector.load %arg7[%c0_42, %c0_43] : memref<1x128xf32, #tpu.memory_space<vmem>>, vector<1x128xf32>
    %40 = vector.broadcast %39 : vector<1x128xf32> to vector<32x128xf32>
    %41 = arith.addf %38, %40 : vector<32x128xf32>
    %cst_44 = arith.constant 0.000000e+00 : f32
    %42 = vector.broadcast %cst_44 : f32 to vector<32x128xf32>
    %43 = arith.cmpf oge, %41, %42 : vector<32x128xf32>
    %cst_45 = arith.constant 1.000000e-01 : f32
    %44 = vector.broadcast %cst_45 : f32 to vector<32x128xf32>
    %45 = arith.mulf %44, %41 : vector<32x128xf32>
    %46 = arith.select %43, %41, %45 : vector<32x128xi1>, vector<32x128xf32>
    %47 = vector.shape_cast %46 : vector<32x128xf32> to vector<2x16x128xf32>
    %c0_46 = arith.constant 0 : index
    %c0_47 = arith.constant 0 : index
    %c0_48 = arith.constant 0 : index
    %48 = vector.load %arg11[%c0_46, %c0_47, %c0_48] : memref<2x16x128xf32, #tpu.memory_space<vmem>>, vector<2x16x128xf32>
    tpu.vector_store %arg11[%c0_46, %c0_47, %c0_48], %47 {strides = array<i32>} : memref<2x16x128xf32, #tpu.memory_space<vmem>>, vector<2x16x128xf32>,
    %49 = vector.shape_cast %46 : vector<32x128xf32> to vector<16x256xf32>
    %c0_49 = arith.constant 0 : index
    %c0_50 = arith.constant 0 : index
    %50 = vector.load %arg8[%c0_49, %c0_50] : memref<256x128xf32, #tpu.memory_space<vmem>>, vector<256x128xf32>
    %cst_51 = arith.constant dense<0.000000e+00> : vector<16x128xf32>
    %51 = tpu.matmul %49, %50, %cst_51 {dimension_numbers = #tpu.dot_dimension_numbers<[1], [0], [0], [1], [0, 0, 1, 1], [], []>} : vector<16x256xf32>, vector<256x128xf32>, vector<16x128xf32> -> vector<16x128xf32>
    %c0_52 = arith.constant 0 : index
    %c0_53 = arith.constant 0 : index
    %52 = vector.load %arg9[%c0_52, %c0_53] : memref<1x128xf32, #tpu.memory_space<vmem>>, vector<1x128xf32>
    %53 = vector.broadcast %52 : vector<1x128xf32> to vector<16x128xf32>
    %54 = arith.mulf %51, %53 : vector<16x128xf32>
    %c0_54 = arith.constant 0 : index
    %c0_55 = arith.constant 0 : index
    %55 = vector.load %arg10[%c0_54, %c0_55] : memref<1x128xf32, #tpu.memory_space<vmem>>, vector<1x128xf32>
    %56 = vector.broadcast %55 : vector<1x128xf32> to vector<16x128xf32>
    %57 = arith.addf %54, %56 : vector<16x128xf32>
    %cst_56 = arith.constant 0.000000e+00 : f32
    %58 = vector.broadcast %cst_56 : f32 to vector<16x128xf32>
    %59 = arith.cmpf oge, %57, %58 : vector<16x128xf32>
    %cst_57 = arith.constant 1.000000e-01 : f32
    %60 = vector.broadcast %cst_57 : f32 to vector<16x128xf32>
    %61 = arith.mulf %60, %57 : vector<16x128xf32>
    %62 = arith.select %59, %57, %61 : vector<16x128xi1>, vector<16x128xf32>
    %63 = vector.shape_cast %62 : vector<16x128xf32> to vector<2x8x128xf32>
    %c0_58 = arith.constant 0 : index
    %c0_59 = arith.constant 0 : index
    %c0_60 = arith.constant 0 : index
    %64 = vector.load %arg12[%c0_58, %c0_59, %c0_60] : memref<2x8x128xf32, #tpu.memory_space<vmem>>, vector<2x8x128xf32>
    tpu.vector_store %arg12[%c0_58, %c0_59, %c0_60], %63 {strides = array<i32>} : memref<2x8x128xf32, #tpu.memory_space<vmem>>, vector<2x8x128xf32>,
    return
  }
  func.func @transform_0(%arg0: i32) -> (i32, i32, i32) {
    %c0_i32 = arith.constant 0 : i32
    %c0_i32_0 = arith.constant 0 : i32
    %c0_i32_1 = arith.constant 0 : i32
    return %arg0, %c0_i32, %c0_i32_0 : i32, i32, i32
  }
  func.func @transform_1(%arg0: i32) -> (i32, i32) {
    %c0_i32 = arith.constant 0 : i32
    %c0_i32_0 = arith.constant 0 : i32
    %c0_i32_1 = arith.constant 0 : i32
    return %c0_i32, %c0_i32_0 : i32, i32
  }
  func.func @transform_2(%arg0: i32) -> (i32, i32) {
    %c0_i32 = arith.constant 0 : i32
    %c0_i32_0 = arith.constant 0 : i32
    %c0_i32_1 = arith.constant 0 : i32
    return %c0_i32, %c0_i32_0 : i32, i32
  }
  func.func @transform_3(%arg0: i32) -> (i32, i32) {
    %c0_i32 = arith.constant 0 : i32
    %c0_i32_0 = arith.constant 0 : i32
    %c0_i32_1 = arith.constant 0 : i32
    return %c0_i32, %c0_i32_0 : i32, i32
  }
  func.func @transform_4(%arg0: i32) -> (i32, i32) {
    %c0_i32 = arith.constant 0 : i32
    %c0_i32_0 = arith.constant 0 : i32
    %c0_i32_1 = arith.constant 0 : i32
    return %c0_i32, %c0_i32_0 : i32, i32
  }
  func.func @transform_5(%arg0: i32) -> (i32, i32) {
    %c0_i32 = arith.constant 0 : i32
    %c0_i32_0 = arith.constant 0 : i32
    %c0_i32_1 = arith.constant 0 : i32
    return %c0_i32, %c0_i32_0 : i32, i32
  }
  func.func @transform_6(%arg0: i32) -> (i32, i32) {
    %c0_i32 = arith.constant 0 : i32
    %c0_i32_0 = arith.constant 0 : i32
    %c0_i32_1 = arith.constant 0 : i32
    return %c0_i32, %c0_i32_0 : i32, i32
  }
  func.func @transform_7(%arg0: i32) -> (i32, i32) {
    %c0_i32 = arith.constant 0 : i32
    %c0_i32_0 = arith.constant 0 : i32
    %c0_i32_1 = arith.constant 0 : i32
    return %c0_i32, %c0_i32_0 : i32, i32
  }
  func.func @transform_8(%arg0: i32) -> (i32, i32) {
    %c0_i32 = arith.constant 0 : i32
    %c0_i32_0 = arith.constant 0 : i32
    %c0_i32_1 = arith.constant 0 : i32
    return %c0_i32, %c0_i32_0 : i32, i32
  }
  func.func @transform_9(%arg0: i32) -> (i32, i32) {
    %c0_i32 = arith.constant 0 : i32
    %c0_i32_0 = arith.constant 0 : i32
    %c0_i32_1 = arith.constant 0 : i32
    return %c0_i32, %c0_i32_0 : i32, i32
  }
  func.func @transform_10(%arg0: i32) -> (i32, i32, i32) {
    %c0_i32 = arith.constant 0 : i32
    %c0_i32_0 = arith.constant 0 : i32
    %c0_i32_1 = arith.constant 0 : i32
    return %arg0, %c0_i32, %c0_i32_0 : i32, i32, i32
  }
  func.func @transform_11(%arg0: i32) -> (i32, i32, i32) {
    %c0_i32 = arith.constant 0 : i32
    %c0_i32_0 = arith.constant 0 : i32
    %c0_i32_1 = arith.constant 0 : i32
    return %arg0, %c0_i32, %c0_i32_0 : i32, i32, i32
  }
}

</mosaic_0001>

<bundles_post_ra>
// kernel: tile.33
= control target key start
LH: loop header
LB: loop body
LE: loop exit
PB: predicated region body
PF: predicated region fallthrough
CT: control target
= control target key end

     0   :  { %s28_s0 = inlined_call_operand.vmem [shape: f32[8], index: 0, kind: input, shape index: {}]   ;;  %s29_s1 = inlined_call_operand.vmem [shape: f32[16,8], index: 1, kind: output, shape index: {}]  }
   0x1   :  { %v4_v0 = vld [vmem:[%s28_s0] ss:$0 sm:$0xff] }
   0x2   :  { %5 = vst [vmem:[%s29_s1] sm:$0xff] %v4_v0  ;;  %8 = vst [vmem:[%s29_s1 + $0x8] sm:$0xff] %v4_v0 }

// kernel: tile.34
= control target key start
LH: loop header
LB: loop body
LE: loop exit
PB: predicated region body
PF: predicated region fallthrough
CT: control target
= control target key end

     0   :  { %s131_s10 = smov 120   ;;  %s132_s11 = smov 104   ;;  %vm3_vm0 = vcmask 64512   ;;  %vm9_vm1 = vcmask 1048512   ;;  %vm15_vm2 = vcmask 982912   ;;  %vm21_vm3 = vcmask 917312   ;;  %s207_s0 = inlined_call_operand.vmem [shape: f32[16,8], index: 0, kind: input, shape index: {}]   ;;  %s208_s1 = inlined_call_operand.vmem [shape: f32[1,128], index: 1, kind: output, shape index: {}]  }
   0x1   :  { %v101_v0 = vld [vmem:[%s207_s0 + $0xf] sm:$0x1]   ;;  %v103_v1 = vld [vmem:[%s207_s0 + $0xd] sm:$0x1]   ;;  %v102_v2 = vld [vmem:[%s207_s0 + $0xe] sm:$0x1]  }
   0x2   :  { %7 = vrot.lane.b32.xlu0 %v101_v0, %s131_s10  ;;  %19 = vrot.lane.b32.xlu1 %v103_v1, %s132_s11  ;;  %v104_v3 = vld [vmem:[%s207_s0 + $0xc] sm:$0x1]   ;;  %s133_s16 = smov 112   ;;  %s134_s17 = smov 96   ;;  %v105_v4 = vld [vmem:[%s207_s0 + $0xb] sm:$0x1]  }
   0x3   :  { %v106_v5 = vld [vmem:[%s207_s0 + $0xa] sm:$0x1]   ;;  %v2_v6 = vld [vmem:[%s207_s0] sm:$0x1]   ;;  %s135_s24 = smov 88   ;;  %s136_s25 = smov 80  }
   0x4   :  { %4 = vst.msk [vmem:[#allocation0] sm:$0x1] %vm3_vm0, %v2_v6   ;;  %v107_v7 = vld [vmem:[%s207_s0 + $0x9] sm:$0x1]   ;;  %v108_v8 = vld [vmem:[%s207_s0 + $0x8] sm:$0x1]  }
   0x5   :  { %s137_s30 = smov 72   ;;  %s138_s2 = smov 64   ;;  %v109_v9 = vld [vmem:[%s207_s0 + $0x7] sm:$0x1]   ;;  %v110_v10 = vld [vmem:[%s207_s0 + $0x6] sm:$0x1]  }
   0x6   :  { %13 = vrot.lane.b32.xlu0 %v102_v2, %s133_s16  ;;  %25 = vrot.lane.b32.xlu1 %v104_v3, %s134_s17  ;;  %s139_s7 = smov 56   ;;  %s140_s8 = smov 48   ;;  %v111_v11 = vld [vmem:[%s207_s0 + $0x5] sm:$0x1]   ;;  %v112_v12 = vld [vmem:[%s207_s0 + $0x4] sm:$0x1]  }
   0x7   :  { %s141_s13 = smov 40   ;;  %s142_s14 = smov 32   ;;  %v113_v13 = vld [vmem:[%s207_s0 + $0x3] sm:$0x1]   ;;  %v114_v14 = vld [vmem:[%s207_s0 + $0x2] sm:$0x1]  }
   0x8   :  { %s143_s19 = smov 24   ;;  %s144_s20 = smov 16   ;;  %v115_v15 = vld [vmem:[%s207_s0 + $0x1] sm:$0x1]   ;;  %vm27_vm4 = vcmask 851712   ;;  %vm33_vm5 = vcmask 786112  }
   0x9   :  { %s145_s0 = smov 8   ;;  %vm39_vm6 = vcmask 720512   ;;  %vm45_vm7 = vcmask 654912   ;;  %vm51_vm8 = vcmask 589312   ;;  %vm57_vm9 = vcmask 523712  }
   0xa   :  { %31 = vrot.lane.b32.xlu0 %v105_v4, %s135_s24  ;;  %37 = vrot.lane.b32.xlu1 %v106_v5, %s136_s25  ;;  %vm63_vm10 = vcmask 458112   ;;  %vm69_vm11 = vcmask 392512   ;;  %vm75_vm12 = vcmask 326912   ;;  %vm81_vm13 = vcmask 261312  }
   0xb   :  { %vm87_vm14 = vcmask 195712   ;;  %vm93_vm15 = vcmask 130112  }
   0xe   :  { %43 = vrot.lane.b32.xlu0 %v107_v7, %s137_s30  ;;  %49 = vrot.lane.b32.xlu1 %v108_v8, %s138_s2 }
  0x12   :  { %55 = vrot.lane.b32.xlu0 %v109_v9, %s139_s7  ;;  %61 = vrot.lane.b32.xlu1 %v110_v10, %s140_s8 }
  0x16   :  { %67 = vrot.lane.b32.xlu0 %v111_v11, %s141_s13  ;;  %73 = vrot.lane.b32.xlu1 %v112_v12, %s142_s14 }
  0x1a   :  { %79 = vrot.lane.b32.xlu0 %v113_v13, %s143_s19  ;;  %85 = vrot.lane.b32.xlu1 %v114_v14, %s144_s20 }
  0x1e   :  { %91 = vrot.lane.b32.xlu0 %v115_v15, %s145_s0 }
  0x74   :  { %v8_v16 = vpop.permute.xlu0 %7   ;;  %v20_v17 = vpop.permute.xlu1 %19  }
  0x75   :  { %10 = vst.msk [vmem:[#allocation0] sm:$0x1] %vm9_vm1, %v8_v16  }
  0x78   :  { %v14_v18 = vpop.permute.xlu0 %13   ;;  %v26_v19 = vpop.permute.xlu1 %25  }
  0x79   :  { %16 = vst.msk [vmem:[#allocation0] sm:$0x1] %vm15_vm2, %v14_v18  }
  0x7a   :  { %22 = vst.msk [vmem:[#allocation0] sm:$0x1] %vm21_vm3, %v20_v17  }
  0x7b   :  { %28 = vst.msk [vmem:[#allocation0] sm:$0x1] %vm27_vm4, %v26_v19  }
  0x7c   :  { %v32_v20 = vpop.permute.xlu0 %31   ;;  %v38_v21 = vpop.permute.xlu1 %37  }
  0x7d   :  { %34 = vst.msk [vmem:[#allocation0] sm:$0x1] %vm33_vm5, %v32_v20  }
  0x7e   :  { %40 = vst.msk [vmem:[#allocation0] sm:$0x1] %vm39_vm6, %v38_v21  }
  0x80   :  { %v44_v22 = vpop.permute.xlu0 %43   ;;  %v50_v23 = vpop.permute.xlu1 %49  }
  0x81   :  { %46 = vst.msk [vmem:[#allocation0] sm:$0x1] %vm45_vm7, %v44_v22  }
  0x82   :  { %52 = vst.msk [vmem:[#allocation0] sm:$0x1] %vm51_vm8, %v50_v23  }
  0x84   :  { %v56_v24 = vpop.permute.xlu0 %55   ;;  %v62_v25 = vpop.permute.xlu1 %61  }
  0x85   :  { %58 = vst.msk [vmem:[#allocation0] sm:$0x1] %vm57_vm9, %v56_v24  }
  0x86   :  { %64 = vst.msk [vmem:[#allocation0] sm:$0x1] %vm63_vm10, %v62_v25  }
  0x88   :  { %v68_v26 = vpop.permute.xlu0 %67   ;;  %v74_v27 = vpop.permute.xlu1 %73  }
  0x89   :  { %70 = vst.msk [vmem:[#allocation0] sm:$0x1] %vm69_vm11, %v68_v26  }
  0x8a   :  { %76 = vst.msk [vmem:[#allocation0] sm:$0x1] %vm75_vm12, %v74_v27  }
  0x8c   :  { %v80_v28 = vpop.permute.xlu0 %79   ;;  %v86_v29 = vpop.permute.xlu1 %85  }
  0x8d   :  { %82 = vst.msk [vmem:[#allocation0] sm:$0x1] %vm81_vm13, %v80_v28  }
  0x8e   :  { %88 = vst.msk [vmem:[#allocation0] sm:$0x1] %vm87_vm14, %v86_v29  }
  0x90   :  { %v92_v30 = vpop.permute.xlu0 %91  }
  0x91   :  { %94 = vst.msk [vmem:[#allocation0] sm:$0x1] %vm93_vm15, %v92_v30  }
  0x98   :  { %v98_v31 = vld [vmem:[#allocation0] sm:$0x1] }
  0x99   :  { %100 = vst [vmem:[%s208_s1] sm:$0x1] %v98_v31 }

// kernel: tile.53
= control target key start
LH: loop header
LB: loop body
LE: loop exit
PB: predicated region body
PF: predicated region fallthrough
CT: control target
= control target key end

     0   :  { %s22_s0 = inlined_call_operand.vmem [shape: f32[16], index: 0, kind: input, shape index: {}]   ;;  %s23_s1 = inlined_call_operand.vmem [shape: f32[8,16], index: 1, kind: output, shape index: {}]  }
   0x1   :  { %v4_v0 = vld [vmem:[%s22_s0] ss:$0 sm:$0xff] }
   0x2   :  { %5 = vst [vmem:[%s23_s1] sm:$0xff] %v4_v0 }

// kernel: tile.54
= control target key start
LH: loop header
LB: loop body
LE: loop exit
PB: predicated region body
PF: predicated region fallthrough
CT: control target
= control target key end

     0   :  { %s67_s10 = smov 112   ;;  %s68_s11 = smov 80   ;;  %vm3_vm0 = vcmask 130048   ;;  %vm9_vm1 = vcmask 1048448   ;;  %vm15_vm2 = vcmask 917248   ;;  %vm21_vm3 = vcmask 786048   ;;  %s111_s0 = inlined_call_operand.vmem [shape: f32[8,16], index: 0, kind: input, shape index: {}]   ;;  %s112_s1 = inlined_call_operand.vmem [shape: f32[1,128], index: 1, kind: output, shape index: {}]  }
   0x1   :  { %v53_v0 = vld [vmem:[%s111_s0 + $0x7] sm:$0x1]   ;;  %v55_v1 = vld [vmem:[%s111_s0 + $0x5] sm:$0x1]   ;;  %v54_v2 = vld [vmem:[%s111_s0 + $0x6] sm:$0x1]  }
   0x2   :  { %7 = vrot.lane.b32.xlu0 %v53_v0, %s67_s10  ;;  %19 = vrot.lane.b32.xlu1 %v55_v1, %s68_s11  ;;  %v56_v3 = vld [vmem:[%s111_s0 + $0x4] sm:$0x1]   ;;  %v2_v4 = vld [vmem:[%s111_s0] sm:$0x1]   ;;  %s69_s18 = smov 96   ;;  %s70_s19 = smov 64  }
   0x3   :  { %4 = vst.msk [vmem:[#allocation0] sm:$0x1] %vm3_vm0, %v2_v4   ;;  %v57_v5 = vld [vmem:[%s111_s0 + $0x3] sm:$0x1]   ;;  %v58_v6 = vld [vmem:[%s111_s0 + $0x2] sm:$0x1]  }
   0x4   :  { %s71_s24 = smov 48   ;;  %s72_s25 = smov 32   ;;  %v59_v7 = vld [vmem:[%s111_s0 + $0x1] sm:$0x1]   ;;  %vm27_vm4 = vcmask 654848   ;;  %vm33_vm5 = vcmask 523648  }
   0x5   :  { %s73_s0 = smov 16   ;;  %vm39_vm6 = vcmask 392448   ;;  %vm45_vm7 = vcmask 261248  }
   0x6   :  { %13 = vrot.lane.b32.xlu0 %v54_v2, %s69_s18  ;;  %25 = vrot.lane.b32.xlu1 %v56_v3, %s70_s19 }
   0xa   :  { %31 = vrot.lane.b32.xlu0 %v57_v5, %s71_s24  ;;  %37 = vrot.lane.b32.xlu1 %v58_v6, %s72_s25 }
   0xe   :  { %43 = vrot.lane.b32.xlu0 %v59_v7, %s73_s0 }
  0x74   :  { %v8_v8 = vpop.permute.xlu0 %7   ;;  %v20_v9 = vpop.permute.xlu1 %19  }
  0x75   :  { %10 = vst.msk [vmem:[#allocation0] sm:$0x1] %vm9_vm1, %v8_v8  }
  0x78   :  { %v14_v10 = vpop.permute.xlu0 %13   ;;  %v26_v11 = vpop.permute.xlu1 %25  }
  0x79   :  { %16 = vst.msk [vmem:[#allocation0] sm:$0x1] %vm15_vm2, %v14_v10  }
  0x7a   :  { %22 = vst.msk [vmem:[#allocation0] sm:$0x1] %vm21_vm3, %v20_v9  }
  0x7b   :  { %28 = vst.msk [vmem:[#allocation0] sm:$0x1] %vm27_vm4, %v26_v11  }
  0x7c   :  { %v32_v12 = vpop.permute.xlu0 %31   ;;  %v38_v13 = vpop.permute.xlu1 %37  }
  0x7d   :  { %34 = vst.msk [vmem:[#allocation0] sm:$0x1] %vm33_vm5, %v32_v12  }
  0x7e   :  { %40 = vst.msk [vmem:[#allocation0] sm:$0x1] %vm39_vm6, %v38_v13  }
  0x80   :  { %v44_v14 = vpop.permute.xlu0 %43  }
  0x81   :  { %46 = vst.msk [vmem:[#allocation0] sm:$0x1] %vm45_vm7, %v44_v14  }
  0x88   :  { %v50_v15 = vld [vmem:[#allocation0] sm:$0x1] }
  0x89   :  { %52 = vst [vmem:[%s112_s1] sm:$0x1] %v50_v15 }

// kernel: _lambda_.1
= control target key start
LH: loop header
LB: loop body
LE: loop exit
PB: predicated region body
PF: predicated region fallthrough
CT: control target
= control target key end

     0   :  { %v1192_v3 = vmov 0.0   ;;  %s1698_s1 = inlined_call_operand.vmem [shape: f32[384,128], index: 1, kind: input, shape index: {}]   ;;  %s1699_s0 = inlined_call_operand.vmem [shape: f32[2,16,128], index: 0, kind: input, shape index: {}]   ;;  %s1700_s4 = inlined_call_operand.vmem [shape: f32[384,128], index: 4, kind: input, shape index: {}]   ;;  %s1701_s7 = inlined_call_operand.vmem [shape: f32[256,128], index: 7, kind: input, shape index: {}]   ;;  %s1702_s2 = inlined_call_operand.vmem [shape: f32[1,128], index: 2, kind: input, shape index: {}]   ;;  %s1703_s3 = inlined_call_operand.vmem [shape: f32[1,128], index: 3, kind: input, shape index: {}]   ;;  %s1704_s5 = inlined_call_operand.vmem [shape: f32[1,128], index: 5, kind: input, shape index: {}]   ;;  %s1705_s6 = inlined_call_operand.vmem [shape: f32[1,128], index: 6, kind: input, shape index: {}]   ;;  %s1706_s10 = inlined_call_operand.vmem [shape: f32[2,16,128], index: 10, kind: output, shape index: {0}]   ;;  %s1707_s8 = inlined_call_operand.vmem [shape: f32[1,128], index: 8, kind: input, shape index: {}]   ;;  %s1708_s9 = inlined_call_operand.vmem [shape: f32[1,128], index: 9, kind: input, shape index: {}]   ;;  %s1709_s11 = inlined_call_operand.vmem [shape: f32[2,8,128], index: 11, kind: output, shape index: {1}]  }
   0x1   :  { %v77_v0 = vld [vmem:[%s1698_s1 + $0x80] sm:$0xff]  ;;  %v78_v1 = vld [vmem:[%s1698_s1 + $0x88] sm:$0xff]  ;;  %37 = vst [vmem:[#allocation2] sm:$0xff] %v1192_v3  ;;  %38 = vst [vmem:[#allocation2 + $0x20] sm:$0xff] %v1192_v3 }
   0x2   :  { %v61_v2 = vld [vmem:[%s1698_s1] sm:$0xff]  ;;  %39 = vst [vmem:[#allocation2 + $0x18] sm:$0xff] %v1192_v3  ;;  %40 = vst [vmem:[#allocation2 + $0x38] sm:$0xff] %v1192_v3  ;;  %v1014_v4 = vpack.c.bf16 %v78_v1, %v77_v0  ;;  %v62_v5 = vld [vmem:[%s1698_s1 + $0x8] sm:$0xff] }
   0x3   :  { %v93_v6 = vld [vmem:[%s1698_s1 + $0x100] sm:$0xff]  ;;  %v94_v7 = vld [vmem:[%s1698_s1 + $0x108] sm:$0xff]  ;;  %v1016_v8 = vpack.c.bf16 %v62_v5, %v61_v2  ;;  %v79_v10 = vld [vmem:[%s1698_s1 + $0x90] sm:$0xff] }
   0x4   :  { %v1046_v9 = vpack.c.bf16 %v94_v7, %v93_v6  ;;  %v80_v11 = vld [vmem:[%s1698_s1 + $0x98] sm:$0xff]  ;;  %v63_v12 = vld [vmem:[%s1698_s1 + $0x10] sm:$0xff]  ;;  %1015 = vmatprep.subr.bf16.mxu0 %v1014_v4  ;;  %v81_v19 = vld [vmem:[%s1698_s1 + $0xa0] sm:$0xff] }
   0x5   :  { %v1018_v13 = vpack.c.bf16 %v80_v11, %v79_v10  ;;  %v64_v14 = vld [vmem:[%s1698_s1 + $0x18] sm:$0xff]  ;;  %v95_v15 = vld [vmem:[%s1698_s1 + $0x110] sm:$0xff]  ;;  %1017 = vmatpush3.bf16.msra.mxu0 %v1016_v8  ;;  %v82_v20 = vld [vmem:[%s1698_s1 + $0xa8] sm:$0xff] }
   0x6   :  { %v96_v16 = vld [vmem:[%s1698_s1 + $0x118] sm:$0xff]  ;;  %1047 = vmatprep.subr.bf16.mxu1 %v1046_v9  ;;  %v1020_v17 = vpack.c.bf16 %v64_v14, %v63_v12  ;;  %v65_v21 = vld [vmem:[%s1698_s1 + $0x20] sm:$0xff]  ;;  %v1022_v22 = vpack.c.bf16 %v82_v20, %v81_v19  ;;  %v66_v23 = vld [vmem:[%s1698_s1 + $0x28] sm:$0xff] }
   0x7   :  { %v1050_v18 = vpack.c.bf16 %v96_v16, %v95_v15  ;;  %1049 = vmatpush3.bf16.msra.mxu1 %v1046_v9  ;;  %1019 = vmatprep.subr.bf16.mxu0 %v1018_v13  ;;  %v97_v24 = vld [vmem:[%s1698_s1 + $0x120] sm:$0xff]  ;;  %v98_v25 = vld [vmem:[%s1698_s1 + $0x128] sm:$0xff]  ;;  %v83_v27 = vld [vmem:[%s1698_s1 + $0xb0] sm:$0xff]  ;;  %v1024_v31 = vpack.c.bf16 %v66_v23, %v65_v21 }
   0x8   :  { %v1054_v26 = vpack.c.bf16 %v98_v25, %v97_v24  ;;  %v84_v28 = vld [vmem:[%s1698_s1 + $0xb8] sm:$0xff]  ;;  %v99_v29 = vld [vmem:[%s1698_s1 + $0x130] sm:$0xff]  ;;  %v85_v36 = vld [vmem:[%s1698_s1 + $0xc0] sm:$0xff] }
   0x9   :  { %1051 = vmatprep.subr.bf16.mxu1 %v1050_v18  ;;  %v100_v30 = vld [vmem:[%s1698_s1 + $0x138] sm:$0xff]  ;;  %1021 = vmatpush3.bf16.msra.mxu0 %v1020_v17  ;;  %v1026_v32 = vpack.c.bf16 %v84_v28, %v83_v27  ;;  %v67_v33 = vld [vmem:[%s1698_s1 + $0x30] sm:$0xff]  ;;  %v86_v37 = vld [vmem:[%s1698_s1 + $0xc8] sm:$0xff] }
   0xa   :  { %1023 = vmatprep.subr.bf16.mxu0 %v1022_v22  ;;  %v68_v34 = vld [vmem:[%s1698_s1 + $0x38] sm:$0xff]  ;;  %v1058_v35 = vpack.c.bf16 %v100_v30, %v99_v29  ;;  %v101_v38 = vld [vmem:[%s1698_s1 + $0x140] sm:$0xff]  ;;  %v102_v39 = vld [vmem:[%s1698_s1 + $0x148] sm:$0xff]  ;;  %v1030_v41 = vpack.c.bf16 %v86_v37, %v85_v36 }
   0xb   :  { %1053 = vmatpush3.bf16.msra.mxu1 %v1050_v18  ;;  %v1028_v40 = vpack.c.bf16 %v68_v34, %v67_v33  ;;  %v69_v42 = vld [vmem:[%s1698_s1 + $0x40] sm:$0xff]  ;;  %v70_v43 = vld [vmem:[%s1698_s1 + $0x48] sm:$0xff]  ;;  %v1062_v44 = vpack.c.bf16 %v102_v39, %v101_v38  ;;  %v87_v45 = vld [vmem:[%s1698_s1 + $0xd0] sm:$0xff] }
   0xc   :  { %1055 = vmatprep.subr.bf16.mxu1 %v1054_v26  ;;  %v88_v46 = vld [vmem:[%s1698_s1 + $0xd8] sm:$0xff]  ;;  %v103_v47 = vld [vmem:[%s1698_s1 + $0x150] sm:$0xff]  ;;  %v1032_v49 = vpack.c.bf16 %v70_v43, %v69_v42  ;;  %v41_v50 = vld [vmem:[%s1699_s0] sm:$0xff] }
   0xd   :  { %1025 = vmatpush3.bf16.msra.mxu0 %v1024_v31  ;;  %v104_v48 = vld [vmem:[%s1698_s1 + $0x158] sm:$0xff]  ;;  %v1362_v51 = vld [vmem:[%s1699_s0 + $0x8] sm:$0xff]  ;;  %v1367_v52 = vld [vmem:[%s1699_s0 + $0x10] sm:$0xff]  ;;  %v1034_v53 = vpack.c.bf16 %v88_v46, %v87_v45  ;;  %45 = vst [vmem:[#allocation2 + $0x8] sm:$0xff] %v41_v50  ;;  %173 = vmatprep.mubr.f32.mxu0 %v41_v50 }
   0xe   :  { %1027 = vmatprep.subr.bf16.mxu0 %v1026_v32  ;;  %v71_v54 = vld [vmem:[%s1698_s1 + $0x50] sm:$0xff]  ;;  %v72_v55 = vld [vmem:[%s1698_s1 + $0x58] sm:$0xff]  ;;  %46 = vst [vmem:[#allocation2 + $0x10] sm:$0xff] %v1362_v51  ;;  %47 = vst [vmem:[#allocation2 + $0x28] sm:$0xff] %v1367_v52  ;;  %v1066_v57 = vpack.c.bf16 %v104_v48, %v103_v47 }
   0xf   :  { %1057 = vmatpush3.bf16.msra.mxu1 %v1054_v26  ;;  %v1380_v56 = vld [vmem:[%s1699_s0 + $0x18] sm:$0xff]  ;;  %v89_v58 = vld [vmem:[%s1698_s1 + $0xe0] sm:$0xff]  ;;  %v90_v59 = vld [vmem:[%s1698_s1 + $0xe8] sm:$0xff]  ;;  %v1036_v62 = vpack.c.bf16 %v72_v55, %v71_v54 }
  0x10   :  { %1059 = vmatprep.subr.bf16.mxu1 %v1058_v35  ;;  %48 = vst [vmem:[#allocation2 + $0x30] sm:$0xff] %v1380_v56  ;;  %v105_v60 = vld [vmem:[%s1698_s1 + $0x160] sm:$0xff]  ;;  %v106_v61 = vld [vmem:[%s1698_s1 + $0x168] sm:$0xff]  ;;  %v1038_v63 = vpack.c.bf16 %v90_v59, %v89_v58  ;;  %v91_v3 = vld [vmem:[%s1698_s1 + $0xf0] sm:$0xff] }
  0x11   :  { %1029 = vmatpush3.bf16.msra.mxu0 %v1028_v40  ;;  %v73_v0 = vld [vmem:[%s1698_s1 + $0x60] sm:$0xff]  ;;  %v74_v1 = vld [vmem:[%s1698_s1 + $0x68] sm:$0xff]  ;;  %v1070_v2 = vpack.c.bf16 %v106_v61, %v105_v60  ;;  %v92_v4 = vld [vmem:[%s1698_s1 + $0xf8] sm:$0xff] }
  0x12   :  { %1031 = vmatprep.subr.bf16.mxu0 %v1030_v41  ;;  %v107_v5 = vld [vmem:[%s1698_s1 + $0x170] sm:$0xff]  ;;  %v108_v6 = vld [vmem:[%s1698_s1 + $0x178] sm:$0xff]  ;;  %v1040_v7 = vpack.c.bf16 %v74_v1, %v73_v0  ;;  %v1042_v9 = vpack.c.bf16 %v92_v4, %v91_v3  ;;  %v345_v13 = vld [vmem:[%s1700_s4 + $0x80] sm:$0xff] }
  0x13   :  { %1061 = vmatpush3.bf16.msra.mxu1 %v1058_v35  ;;  %v75_v10 = vld [vmem:[%s1698_s1 + $0x70] sm:$0xff]  ;;  %v76_v11 = vld [vmem:[%s1698_s1 + $0x78] sm:$0xff]  ;;  %v1074_v12 = vpack.c.bf16 %v108_v6, %v107_v5  ;;  %v346_v14 = vld [vmem:[%s1700_s4 + $0x88] sm:$0xff] }
  0x14   :  { %1063 = vmatprep.subr.bf16.mxu1 %v1062_v44  ;;  %v361_v15 = vld [vmem:[%s1700_s4 + $0x100] sm:$0xff]  ;;  %v362_v16 = vld [vmem:[%s1700_s4 + $0x108] sm:$0xff]  ;;  %v1044_v17 = vpack.c.bf16 %v76_v11, %v75_v10  ;;  %v1078_v18 = vpack.c.bf16 %v346_v14, %v345_v13  ;;  %v347_v22 = vld [vmem:[%s1700_s4 + $0x90] sm:$0xff] }
  0x15   :  { %1033 = vmatpush3.bf16.msra.mxu0 %v1032_v49  ;;  %v57_v8 = vld [vmem:[#allocation2 + $0x9] sm:$0xff]  ;;  %v329_v19 = vld [vmem:[%s1700_s4] sm:$0xff]  ;;  %v1110_v21 = vpack.c.bf16 %v362_v16, %v361_v15  ;;  %v348_v23 = vld [vmem:[%s1700_s4 + $0x98] sm:$0xff] }
  0x16   :  { %1035 = vmatprep.subr.bf16.mxu0 %v1034_v53  ;;  %970 = vmatprep.mubr.f32.mxu1 %v57_v8  ;;  %v330_v20 = vld [vmem:[%s1700_s4 + $0x8] sm:$0xff]  ;;  %v363_v25 = vld [vmem:[%s1700_s4 + $0x110] sm:$0xff]  ;;  %v364_v26 = vld [vmem:[%s1700_s4 + $0x118] sm:$0xff]  ;;  %v1082_v30 = vpack.c.bf16 %v348_v23, %v347_v22 }
  0x17   :  { %1065 = vmatpush3.bf16.msra.mxu1 %v1062_v44  ;;  %v49_v24 = vld [vmem:[#allocation2 + $0x7] sm:$0xff]  ;;  %v58_v27 = vld [vmem:[#allocation2 + $0x11] sm:$0xff]  ;;  %v1080_v28 = vpack.c.bf16 %v330_v20, %v329_v19  ;;  %v1114_v35 = vpack.c.bf16 %v364_v26, %v363_v25 }
  0x18   :  { %1067 = vmatprep.subr.bf16.mxu1 %v1066_v57  ;;  %v59_v29 = vld [vmem:[#allocation2 + $0x29] sm:$0xff]  ;;  %v332_v32 = vld [vmem:[%s1700_s4 + $0x18] sm:$0xff]  ;;  %v349_v33 = vld [vmem:[%s1700_s4 + $0xa0] sm:$0xff] }
  0x19   :  { %1037 = vmatpush3.bf16.msra.mxu0 %v1036_v62  ;;  %v331_v31 = vld [vmem:[%s1700_s4 + $0x10] sm:$0xff]  ;;  %v350_v34 = vld [vmem:[%s1700_s4 + $0xa8] sm:$0xff]  ;;  %v333_v40 = vld [vmem:[%s1700_s4 + $0x20] sm:$0xff] }
  0x1a   :  { %1039 = vmatprep.subr.bf16.mxu0 %v1038_v63  ;;  %v50_v36 = vld [vmem:[#allocation2 + $0xf] sm:$0xff]  ;;  %v1084_v38 = vpack.c.bf16 %v332_v32, %v331_v31  ;;  %v1086_v39 = vpack.c.bf16 %v350_v34, %v349_v33  ;;  %v51_v42 = vld [vmem:[#allocation2 + $0x27] sm:$0xff]  ;;  %v352_v46 = vld [vmem:[%s1700_s4 + $0xb8] sm:$0xff] }
  0x1b   :  { %1069 = vmatpush3.bf16.msra.mxu1 %v1066_v57  ;;  %v60_v37 = vld [vmem:[#allocation2 + $0x31] sm:$0xff]  ;;  %v334_v41 = vld [vmem:[%s1700_s4 + $0x28] sm:$0xff]  ;;  %v365_v48 = vld [vmem:[%s1700_s4 + $0x120] sm:$0xff] }
  0x1c   :  { %1071 = vmatprep.subr.bf16.mxu1 %v1070_v2  ;;  %v1088_v43 = vpack.c.bf16 %v334_v41, %v333_v40  ;;  %v52_v44 = vld [vmem:[#allocation2 + $0x2f] sm:$0xff]  ;;  %v353_v54 = vld [vmem:[%s1700_s4 + $0xc0] sm:$0xff]  ;;  %v368_v58 = vld [vmem:[%s1700_s4 + $0x138] sm:$0xff] }
  0x1d   :  { %1041 = vmatpush3.bf16.msra.mxu0 %v1040_v7  ;;  %v351_v45 = vld [vmem:[%s1700_s4 + $0xb0] sm:$0xff]  ;;  %v366_v49 = vld [vmem:[%s1700_s4 + $0x128] sm:$0xff]  ;;  %v337_v59 = vld [vmem:[%s1700_s4 + $0x40] sm:$0xff] }
  0x1e   :  { %1043 = vmatprep.subr.bf16.mxu0 %v1042_v9  ;;  %v1090_v47 = vpack.c.bf16 %v352_v46, %v351_v45  ;;  %v335_v50 = vld [vmem:[%s1700_s4 + $0x30] sm:$0xff]  ;;  %v354_v55 = vld [vmem:[%s1700_s4 + $0xc8] sm:$0xff]  ;;  %v356_v0 = vld [vmem:[%s1700_s4 + $0xd8] sm:$0xff] }
  0x1f   :  { %1073 = vmatpush3.bf16.msra.mxu1 %v1070_v2  ;;  %v367_v57 = vld [vmem:[%s1700_s4 + $0x130] sm:$0xff]  ;;  %v338_v61 = vld [vmem:[%s1700_s4 + $0x48] sm:$0xff]  ;;  %v369_v2 = vld [vmem:[%s1700_s4 + $0x140] sm:$0xff] }
  0x20   :  { %1075 = vmatprep.subr.bf16.mxu1 %v1074_v12  ;;  %v1122_v60 = vpack.c.bf16 %v368_v58, %v367_v57  ;;  %v1096_v62 = vpack.c.bf16 %v338_v61, %v337_v59  ;;  %v355_v63 = vld [vmem:[%s1700_s4 + $0xd0] sm:$0xff]  ;;  %v370_v3 = vld [vmem:[%s1700_s4 + $0x148] sm:$0xff]  ;;  %v340_v6 = vld [vmem:[%s1700_s4 + $0x58] sm:$0xff] }
  0x21   :  { %1045 = vmatpush3.bf16.msra.mxu0 %v1044_v17  ;;  %v1098_v1 = vpack.c.bf16 %v356_v0, %v355_v63  ;;  %v339_v4 = vld [vmem:[%s1700_s4 + $0x50] sm:$0xff]  ;;  %v1126_v5 = vpack.c.bf16 %v370_v3, %v369_v2  ;;  %v357_v8 = vld [vmem:[%s1700_s4 + $0xe0] sm:$0xff]  ;;  %v358_v9 = vld [vmem:[%s1700_s4 + $0xe8] sm:$0xff] }
  0x22   :  { %1079 = vmatprep.subr.bf16.mxu0 %v1078_v18  ;;  %v1100_v7 = vpack.c.bf16 %v340_v6, %v339_v4  ;;  %v1102_v10 = vpack.c.bf16 %v358_v9, %v357_v8  ;;  %v371_v11 = vld [vmem:[%s1700_s4 + $0x150] sm:$0xff]  ;;  %v341_v13 = vld [vmem:[%s1700_s4 + $0x60] sm:$0xff]  ;;  %v342_v15 = vld [vmem:[%s1700_s4 + $0x68] sm:$0xff] }
  0x23   :  { %1077 = vmatpush3.bf16.msra.mxu1 %v1074_v12  ;;  %v372_v12 = vld [vmem:[%s1700_s4 + $0x158] sm:$0xff]  ;;  %v1104_v16 = vpack.c.bf16 %v342_v15, %v341_v13  ;;  %v359_v17 = vld [vmem:[%s1700_s4 + $0xf0] sm:$0xff]  ;;  %v373_v20 = vld [vmem:[%s1700_s4 + $0x160] sm:$0xff] }
  0x24   :  { %1111 = vmatprep.subr.bf16.mxu1 %v1110_v21  ;;  %174 = vmatmul.mubr.f32.vlgmr.msra.gmra.mrb[0].mxu0 %v49_v24  ;;  %v1130_v14 = vpack.c.bf16 %v372_v12, %v371_v11  ;;  %v360_v18 = vld [vmem:[%s1700_s4 + $0xf8] sm:$0xff]  ;;  %v343_v22 = vld [vmem:[%s1700_s4 + $0x70] sm:$0xff]  ;;  %v767_v40 = vld [vmem:[%s1703_s3] ss:$0 sm:$0xff] }
  0x25   :  { %178 = vmatprep.mubr.f32.mxu0 %v1362_v51  ;;  %1081 = vmatpush3.bf16.msra.mxu0 %v1080_v28  ;;  %v1118_v51 = vpack.c.bf16 %v366_v49, %v365_v48  ;;  %v1106_v19 = vpack.c.bf16 %v360_v18, %v359_v17  ;;  %v344_v24 = vld [vmem:[%s1700_s4 + $0x78] sm:$0xff]  ;;  %v375_v26 = vld [vmem:[%s1700_s4 + $0x170] sm:$0xff]  ;;  %v613_v61 = vld [vmem:[%s1701_s7] sm:$0xff] }
  0x26   :  { %971 = vmatmul.mubr.f32.vlgmr.msra.gmra.mrb[0].mxu1 %v58_v27  ;;  %1083 = vmatprep.subr.bf16.mxu0 %v1082_v30  ;;  %v1108_v25 = vpack.c.bf16 %v344_v24, %v343_v22  ;;  %v376_v27 = vld [vmem:[%s1700_s4 + $0x178] sm:$0xff]  ;;  %v630_v30 = vld [vmem:[%s1701_s7 + $0x88] sm:$0xff]  ;;  %v631_v2 = vld [vmem:[%s1701_s7 + $0x90] sm:$0xff] }
  0x27   :  { %973 = vmatprep.mubr.f32.mxu1 %v59_v29  ;;  %1113 = vmatpush3.bf16.msra.mxu1 %v1110_v21  ;;  %v374_v21 = vld [vmem:[%s1700_s4 + $0x168] sm:$0xff]  ;;  %v1138_v28 = vpack.c.bf16 %v376_v27, %v375_v26  ;;  %v629_v29 = vld [vmem:[%s1701_s7 + $0x80] sm:$0xff]  ;;  %v632_v3 = vld [vmem:[%s1701_s7 + $0x98] sm:$0xff] }
  0x28   :  { %179 = vmatmul.mubr.f32.gmra.mrb[2].mxu0 %v50_v36  ;;  %1115 = vmatprep.subr.bf16.mxu1 %v1114_v35  ;;  %v1134_v23 = vpack.c.bf16 %v374_v21, %v373_v20  ;;  %v1142_v31 = vpack.c.bf16 %v630_v30, %v629_v29  ;;  %v615_v11 = vld [vmem:[%s1701_s7 + $0x10] sm:$0xff]  ;;  %v616_v12 = vld [vmem:[%s1701_s7 + $0x18] sm:$0xff]  ;;  %v633_v13 = vld [vmem:[%s1701_s7 + $0xa0] sm:$0xff] }
  0x29   :  { %183 = vmatprep.mubr.f32.mxu0 %v1367_v52  ;;  %1085 = vmatpush3.bf16.msra.mxu0 %v1084_v38  ;;  %v336_v52 = vld [vmem:[%s1700_s4 + $0x38] sm:$0xff]  ;;  %v617_v17 = vld [vmem:[%s1701_s7 + $0x20] sm:$0xff]  ;;  %v618_v18 = vld [vmem:[%s1701_s7 + $0x28] sm:$0xff] }
  0x2a   :  { %974 = vmatmul.mubr.f32.gmra.mrb[2].mxu1 %v60_v37  ;;  %1087 = vmatprep.subr.bf16.mxu0 %v1086_v39  ;;  %v1092_v53 = vpack.c.bf16 %v336_v52, %v335_v50  ;;  %v766_v37 = vld [vmem:[%s1702_s2] ss:$0 sm:$0xff]  ;;  %v1152_v24 = vpack.c.bf16 %v618_v18, %v617_v17  ;;  %v635_v29 = vld [vmem:[%s1701_s7 + $0xb0] sm:$0xff]  ;;  %v636_v30 = vld [vmem:[%s1701_s7 + $0xb8] sm:$0xff] }
  0x2b   :  { %1117 = vmatpush3.bf16.msra.mxu1 %v1114_v35 }
  0x2c   :  { %184 = vmatmul.mubr.f32.gmra.mrb[4].mxu0 %v51_v42  ;;  %1119 = vmatprep.subr.bf16.mxu1 %v1118_v51 }
  0x2d   :  { %188 = vmatprep.mubr.f32.mxu0 %v1380_v56  ;;  %1089 = vmatpush3.bf16.msra.mxu0 %v1088_v43  ;;  %v1094_v56 = vpack.c.bf16 %v354_v55, %v353_v54 }
  0x2e   :  { %1091 = vmatprep.subr.bf16.mxu0 %v1090_v47 }
  0x2f   :  { %1121 = vmatpush3.bf16.msra.mxu1 %v1118_v51 }
  0x30   :  { %189 = vmatmul.mubr.f32.gmra.mrb[6].mxu0 %v52_v44  ;;  %1123 = vmatprep.subr.bf16.mxu1 %v1122_v60 }
  0x31   :  { %1093 = vmatpush3.bf16.msra.mxu0 %v1092_v53 }
  0x32   :  { %1095 = vmatprep.subr.bf16.mxu0 %v1094_v56 }
  0x33   :  { %1125 = vmatpush3.bf16.msra.mxu1 %v1122_v60 }
  0x34   :  { %1127 = vmatprep.subr.bf16.mxu1 %v1126_v5 }
  0x35   :  { %1097 = vmatpush3.bf16.msra.mxu0 %v1096_v62  ;;  %v614_v62 = vld [vmem:[%s1701_s7 + $0x8] sm:$0xff] }
  0x36   :  { %1099 = vmatprep.subr.bf16.mxu0 %v1098_v1  ;;  %v1144_v6 = vpack.c.bf16 %v614_v62, %v613_v61 }
  0x37   :  { %1129 = vmatpush3.bf16.msra.mxu1 %v1126_v5 }
  0x38   :  { %1131 = vmatprep.subr.bf16.mxu1 %v1130_v14 }
  0x39   :  { %1101 = vmatpush3.bf16.msra.mxu0 %v1100_v7  ;;  %v1146_v7 = vpack.c.bf16 %v632_v3, %v631_v2 }
  0x3a   :  { %1103 = vmatprep.subr.bf16.mxu0 %v1102_v10 }
  0x3b   :  { %1133 = vmatpush3.bf16.msra.mxu1 %v1130_v14  ;;  %v634_v14 = vld [vmem:[%s1701_s7 + $0xa8] sm:$0xff] }
  0x3c   :  { %1135 = vmatprep.subr.bf16.mxu1 %v1134_v23 }
  0x3d   :  { %1105 = vmatpush3.bf16.msra.mxu0 %v1104_v16  ;;  %v1148_v16 = vpack.c.bf16 %v616_v12, %v615_v11 }
  0x3e   :  { %1107 = vmatprep.subr.bf16.mxu0 %v1106_v19 }
  0x3f   :  { %1137 = vmatpush3.bf16.msra.mxu1 %v1134_v23  ;;  %v1150_v23 = vpack.c.bf16 %v634_v14, %v633_v13 }
  0x40   :  { %1139 = vmatprep.subr.bf16.mxu1 %v1138_v28 }
  0x41   :  { %1109 = vmatpush3.bf16.msra.mxu0 %v1108_v25 }
  0x42   :  { %1143 = vmatprep.subr.bf16.mxu0 %v1142_v31 }
  0x43   :  { %1141 = vmatpush3.bf16.msra.mxu1 %v1138_v28 }
  0x44   :  { %1174 = vmatprep.subr.bf16.mxu1 %v1142_v31  ;;  %v1154_v31 = vpack.c.bf16 %v636_v30, %v635_v29 }
  0xf7   :  { %v804_v32 = vpop.f32.mrb[0].mxu0 }
  0xf8   :  { %v805_v33 = vpop.f32.mrb[1].mxu0 }
  0xf9   :  { %v972_v34 = vpop.f32.mrb[0].mxu1  ;;  %v806_v35 = vadd.f32 %v805_v33, %v804_v32  ;;  %v619_v32 = vld [vmem:[%s1701_s7 + $0x30] sm:$0xff]  ;;  %v620_v33 = vld [vmem:[%s1701_s7 + $0x38] sm:$0xff] }
  0xfa   :  { %v260_v36 = vpop.f32.mrb[1].mxu1 }
  0xfb   :  { %v261_v38 = vadd.f32 %v806_v35, %v260_v36  ;;  %v807_v39 = vpop.f32.mrb[2].mxu0  ;;  %v637_v35 = vld [vmem:[%s1701_s7 + $0xc0] sm:$0xff]  ;;  %v638_v36 = vld [vmem:[%s1701_s7 + $0xc8] sm:$0xff] }
  0xfc   :  { %v808_v41 = vpop.f32.mrb[3].mxu0 }
  0xfd   :  { %v975_v42 = vpop.f32.mrb[2].mxu1  ;;  %v286_v43 = vmul.f32 %v766_v37, %v261_v38  ;;  %v809_v44 = vadd.f32 %v808_v41, %v807_v39  ;;  %v621_v38 = vld [vmem:[%s1701_s7 + $0x40] sm:$0xff]  ;;  %v622_v39 = vld [vmem:[%s1701_s7 + $0x48] sm:$0xff]  ;;  %v639_v41 = vld [vmem:[%s1701_s7 + $0xd0] sm:$0xff] }
  0xfe   :  { %v270_v45 = vpop.f32.mrb[3].mxu1 }
  0xff   :  { %v297_v46 = vadd.f32 %v767_v40, %v286_v43  ;;  %v266_v47 = vadd.f32 %v972_v34, %v809_v44  ;;  %v810_v48 = vpop.f32.mrb[4].mxu0  ;;  %v1156_v34 = vpack.c.bf16 %v620_v33, %v619_v32  ;;  %v623_v44 = vld [vmem:[%s1701_s7 + $0x50] sm:$0xff] }
 0x100   :  { %v811_v49 = vpop.f32.mrb[5].mxu0 }
 0x101   :  { %vm301_vm0 = vcmp.ge.f32.partialorder %v297_v46, 0.0  ;;  %v305_v50 = vmul.f32 0.1, %v297_v46  ;;  %v287_v51 = vmul.f32 %v766_v37, %v266_v47  ;;  %v812_v52 = vadd.f32 %v811_v49, %v810_v48  ;;  %v641_v47 = vld [vmem:[%s1701_s7 + $0xe0] sm:$0xff]  ;;  %v642_v48 = vld [vmem:[%s1701_s7 + $0xe8] sm:$0xff] }
 0x102   :  { %v1166_v49 = vpack.c.bf16 %v642_v48, %v641_v47 }
 0x103   :  { %v309_v53 = vsel %vm301_vm0, %v297_v46, %v305_v50  ;;  %v298_v54 = vadd.f32 %v767_v40, %v287_v51  ;;  %v271_v55 = vadd.f32 %v812_v52, %v270_v45  ;;  %v813_v56 = vpop.f32.mrb[6].mxu0  ;;  %v624_v45 = vld [vmem:[%s1701_s7 + $0x58] sm:$0xff]  ;;  %v625_v50 = vld [vmem:[%s1701_s7 + $0x60] sm:$0xff]  ;;  %v626_v51 = vld [vmem:[%s1701_s7 + $0x68] sm:$0xff] }
 0x104   :  { %313 = vst [vmem:[#allocation2 + $0x8] sm:$0xff] %v309_v53  ;;  %v814_v57 = vpop.f32.mrb[7].mxu0  ;;  %441 = vmatprep.mubr.f32.mxu0 %v309_v53  ;;  %v1164_v46 = vpack.c.bf16 %v624_v45, %v623_v44  ;;  %v1168_v52 = vpack.c.bf16 %v626_v51, %v625_v50  ;;  %v643_v53 = vld [vmem:[%s1701_s7 + $0xf0] sm:$0xff]  ;;  %v771_v51 = vld [vmem:[%s1708_s9] ss:$0 sm:$0xff] }
 0x105   :  { %vm302_vm1 = vcmp.ge.f32.partialorder %v298_v54, 0.0  ;;  %v306_v58 = vmul.f32 0.1, %v298_v54  ;;  %v288_v59 = vmul.f32 %v766_v37, %v271_v55  ;;  %v815_v60 = vadd.f32 %v814_v57, %v813_v56  ;;  %v627_v56 = vld [vmem:[%s1701_s7 + $0x70] sm:$0xff]  ;;  %v628_v57 = vld [vmem:[%s1701_s7 + $0x78] sm:$0xff] }
 0x107   :  { %v310_v63 = vsel %vm302_vm1, %v298_v54, %v306_v58  ;;  %v299_v0 = vadd.f32 %v767_v40, %v288_v59  ;;  %v276_v1 = vadd.f32 %v975_v42, %v815_v60  ;;  %v640_v42 = vld [vmem:[%s1701_s7 + $0xd8] sm:$0xff]  ;;  %v1172_v58 = vpack.c.bf16 %v628_v57, %v627_v56 }
 0x108   :  { %314 = vst [vmem:[#allocation2 + $0x10] sm:$0xff] %v310_v63  ;;  %v1162_v43 = vpack.c.bf16 %v640_v42, %v639_v41  ;;  %v644_v54 = vld [vmem:[%s1701_s7 + $0xf8] sm:$0xff] }
 0x109   :  { %vm303_vm2 = vcmp.ge.f32.partialorder %v299_v0, 0.0  ;;  %v307_v4 = vmul.f32 0.1, %v299_v0  ;;  %v289_v5 = vmul.f32 %v766_v37, %v276_v1  ;;  %v1158_v37 = vpack.c.bf16 %v638_v36, %v637_v35 }
 0x10a   :  { %v1170_v55 = vpack.c.bf16 %v644_v54, %v643_v53  ;;  %v588_v1 = vlaneseq }
 0x10b   :  { %v311_v8 = vsel %vm303_vm2, %v299_v0, %v307_v4  ;;  %v300_v9 = vadd.f32 %v767_v40, %v289_v5  ;;  %v317_v10 = vld [vmem:[#allocation2 + $0x7] sm:$0xff]  ;;  %v1160_v40 = vpack.c.bf16 %v622_v39, %v621_v38  ;;  %v768_v5 = vld [vmem:[%s1704_s5] ss:$0 sm:$0xff] }
 0x10c   :  { %315 = vst [vmem:[#allocation2 + $0x28] sm:$0xff] %v311_v8  ;;  %442 = vmatmul.mubr.f32.vlgmr.msra.gmra.mrb[8].mxu0 %v317_v10  ;;  %v589_v12 = vshrl.u32 %v588_v1, 7 }
 0x10d   :  { %vm304_vm3 = vcmp.ge.f32.partialorder %v300_v9, 0.0  ;;  %v308_v15 = vmul.f32 0.1, %v300_v9  ;;  %446 = vmatprep.mubr.f32.mxu0 %v310_v63  ;;  %1145 = vmatpush3.bf16.msra.mxu0 %v1144_v6  ;;  %v1193_v63 = vmov 1966171168  }
 0x10e   :  { %1147 = vmatprep.subr.bf16.mxu0 %v1146_v7  ;;  %v586_v0 = vunpack.c.l.s4 %v1193_v63 }
 0x10f   :  { %v312_v19 = vsel %vm304_vm3, %v300_v9, %v308_v15  ;;  %v325_v20 = vld [vmem:[#allocation2 + $0x9] sm:$0xff]  ;;  %v326_v22 = vld [vmem:[#allocation2 + $0x11] sm:$0xff]  ;;  %v769_v9 = vld [vmem:[%s1705_s6] ss:$0 sm:$0xff] }
 0x110   :  { %v318_v21 = vld [vmem:[#allocation2 + $0xf] sm:$0xff]  ;;  %316 = vst [vmem:[#allocation2 + $0x30] sm:$0xff] %v312_v19  ;;  %1008 = vmatprep.mubr.f32.mxu1 %v325_v20  ;;  %v587_v11 = vunpack.c.0.s8 %v586_v0 }
 0x111   :  { %447 = vmatmul.mubr.f32.gmra.mrb[10].mxu0 %v318_v21  ;;  %1009 = vmatmul.mubr.f32.vlgmr.msra.gmra.mrb[4].mxu1 %v326_v22 }
 0x112   :  { %451 = vmatprep.mubr.f32.mxu0 %v311_v8  ;;  %1149 = vmatpush3.bf16.msra.mxu0 %v1148_v16  ;;  %v590_v20 = vsub.s32 %v587_v11, %v589_v12 }
 0x113   :  { %1182 = vmatpush3.bf16.msra.mxu1 %v1144_v6  ;;  %v319_v25 = vld [vmem:[#allocation2 + $0x27] sm:$0xff]  ;;  %1151 = vmatprep.subr.bf16.mxu0 %v1150_v23 }
 0x114   :  { %1175 = vmatprep.subr.bf16.mxu1 %v1146_v7 }
 0x115   :  { %452 = vmatmul.mubr.f32.gmra.mrb[12].mxu0 %v319_v25 }
 0x116   :  { %456 = vmatprep.mubr.f32.mxu0 %v312_v19  ;;  %1153 = vmatpush3.bf16.msra.mxu0 %v1152_v24 }
 0x117   :  { %1183 = vmatpush3.bf16.msra.mxu1 %v1148_v16  ;;  %v327_v26 = vld [vmem:[#allocation2 + $0x29] sm:$0xff]  ;;  %v328_v28 = vld [vmem:[#allocation2 + $0x31] sm:$0xff]  ;;  %1155 = vmatprep.subr.bf16.mxu0 %v1154_v31 }
 0x118   :  { %v320_v27 = vld [vmem:[#allocation2 + $0x2f] sm:$0xff]  ;;  %1176 = vmatprep.subr.bf16.mxu1 %v1150_v23  ;;  %1011 = vmatprep.mubr.f32.mxu1 %v327_v26 }
 0x119   :  { %457 = vmatmul.mubr.f32.gmra.mrb[14].mxu0 %v320_v27  ;;  %1012 = vmatmul.mubr.f32.gmra.mrb[6].mxu1 %v328_v28 }
 0x11a   :  { %1157 = vmatpush3.bf16.msra.mxu0 %v1156_v34 }
 0x11b   :  { %1184 = vmatpush3.bf16.msra.mxu1 %v1152_v24  ;;  %1159 = vmatprep.subr.bf16.mxu0 %v1158_v37 }
 0x11c   :  { %1177 = vmatprep.subr.bf16.mxu1 %v1154_v31 }
 0x11e   :  { %1161 = vmatpush3.bf16.msra.mxu0 %v1160_v40 }
 0x11f   :  { %1185 = vmatpush3.bf16.msra.mxu1 %v1156_v34  ;;  %1163 = vmatprep.subr.bf16.mxu0 %v1162_v43 }
 0x120   :  { %1178 = vmatprep.subr.bf16.mxu1 %v1158_v37 }
 0x122   :  { %1165 = vmatpush3.bf16.msra.mxu0 %v1164_v46 }
 0x123   :  { %1186 = vmatpush3.bf16.msra.mxu1 %v1160_v40  ;;  %1167 = vmatprep.subr.bf16.mxu0 %v1166_v49 }
 0x124   :  { %1179 = vmatprep.subr.bf16.mxu1 %v1162_v43 }
 0x126   :  { %1169 = vmatpush3.bf16.msra.mxu0 %v1168_v52 }
 0x127   :  { %1187 = vmatpush3.bf16.msra.mxu1 %v1164_v46  ;;  %1171 = vmatprep.subr.bf16.mxu0 %v1170_v55 }
 0x128   :  { %1180 = vmatprep.subr.bf16.mxu1 %v1166_v49  ;;  %v770_v49 = vld [vmem:[%s1707_s8] ss:$0 sm:$0xff] }
 0x12a   :  { %1173 = vmatpush3.bf16.msra.mxu0 %v1172_v58 }
 0x12b   :  { %1188 = vmatpush3.bf16.msra.mxu1 %v1168_v52 }
 0x12c   :  { %1181 = vmatprep.subr.bf16.mxu1 %v1170_v55 }
 0x12f   :  { %1189 = vmatpush3.bf16.msra.mxu1 %v1172_v58 }
 0x1df   :  { %v868_v59 = vpop.f32.mrb[8].mxu0 }
 0x1e0   :  { %v869_v60 = vpop.f32.mrb[9].mxu0 }
 0x1e1   :  { %v870_v61 = vadd.f32 %v869_v60, %v868_v59 }
 0x1e4   :  { %v871_v62 = vpop.f32.mrb[10].mxu0  ;;  %v1010_v2 = vpop.f32.mrb[4].mxu1 }
 0x1e5   :  { %v872_v3 = vpop.f32.mrb[11].mxu0  ;;  %v528_v6 = vpop.f32.mrb[5].mxu1 }
 0x1e6   :  { %v873_v4 = vadd.f32 %v872_v3, %v871_v62  ;;  %v529_v7 = vadd.f32 %v870_v61, %v528_v6 }
 0x1e8   :  { %v534_v8 = vadd.f32 %v1010_v2, %v873_v4  ;;  %v874_v10 = vpop.f32.mrb[12].mxu0  ;;  %v554_v13 = vmul.f32 %v768_v5, %v529_v7 }
 0x1e9   :  { %v875_v14 = vpop.f32.mrb[13].mxu0 }
 0x1ea   :  { %v555_v15 = vmul.f32 %v768_v5, %v534_v8  ;;  %v876_v16 = vadd.f32 %v875_v14, %v874_v10  ;;  %v565_v17 = vadd.f32 %v769_v9, %v554_v13 }
 0x1ec   :  { %v566_v18 = vadd.f32 %v769_v9, %v555_v15  ;;  %v877_v19 = vpop.f32.mrb[14].mxu0  ;;  %vm569_vm4 = vcmp.ge.f32.partialorder %v565_v17, 0.0  ;;  %v573_v21 = vmul.f32 0.1, %v565_v17  ;;  %v1013_v22 = vpop.f32.mrb[6].mxu1 }
 0x1ed   :  { %v878_v23 = vpop.f32.mrb[15].mxu0  ;;  %v538_v26 = vpop.f32.mrb[7].mxu1 }
 0x1ee   :  { %v574_v24 = vmul.f32 0.1, %v566_v18  ;;  %v879_v25 = vadd.f32 %v878_v23, %v877_v19  ;;  %vm570_vm5 = vcmp.ge.f32.partialorder %v566_v18, 0.0  ;;  %v539_v27 = vadd.f32 %v876_v16, %v538_v26 }
 0x1ef   :  { %v577_v28 = vsel %vm569_vm4, %v565_v17, %v573_v21 }
 0x1f0   :  { %v544_v29 = vadd.f32 %v1013_v22, %v879_v25  ;;  %v578_v30 = vsel %vm570_vm5, %v566_v18, %v574_v24  ;;  %581 = vst [vmem:[%s1706_s10] sm:$0xff] %v577_v28  ;;  %v591_v31 = vrot.slane %v577_v28, %v590_v20  ;;  %v556_v32 = vmul.f32 %v768_v5, %v539_v27 }
 0x1f1   :  { %582 = vst [vmem:[%s1706_s10 + $0x8] sm:$0xff] %v578_v30  ;;  %v598_v33 = vrot.slane %v578_v30, %v590_v20 }
 0x1f2   :  { %v557_v34 = vmul.f32 %v768_v5, %v544_v29  ;;  %v567_v35 = vadd.f32 %v769_v9, %v556_v32 }
 0x1f3   :  { %v649_v36 = vcombine.low %v591_v31, %v598_v33  ;;  %v650_v37 = vcombine.high %v591_v31, %v598_v33 }
 0x1f4   :  { %v568_v38 = vadd.f32 %v769_v9, %v557_v34  ;;  %vm571_vm6 = vcmp.ge.f32.partialorder %v567_v35, 0.0  ;;  %v575_v39 = vmul.f32 0.1, %v567_v35 }
 0x1f5   :  { %721 = vmatprep.mubr.f32.mxu0 %v650_v37 }
 0x1f6   :  { %v576_v40 = vmul.f32 0.1, %v568_v38  ;;  %722 = vmatmul.mubr.f32.vlgmr.msra.gmra.mrb[16].mxu0 %v649_v36  ;;  %vm572_vm7 = vcmp.ge.f32.partialorder %v568_v38, 0.0  ;;  %v579_v41 = vsel %vm571_vm6, %v567_v35, %v575_v39 }
 0x1f7   :  { %583 = vst [vmem:[%s1706_s10 + $0x10] sm:$0xff] %v579_v41  ;;  %v605_v43 = vrot.slane %v579_v41, %v590_v20 }
 0x1f8   :  { %v580_v42 = vsel %vm572_vm7, %v568_v38, %v576_v40 }
 0x1f9   :  { %584 = vst [vmem:[%s1706_s10 + $0x18] sm:$0xff] %v580_v42  ;;  %v612_v44 = vrot.slane %v580_v42, %v590_v20 }
 0x1fb   :  { %v651_v45 = vcombine.low %v605_v43, %v612_v44  ;;  %v652_v46 = vcombine.high %v605_v43, %v612_v44 }
 0x1fd   :  { %726 = vmatprep.mubr.f32.mxu1 %v652_v46 }
 0x1fe   :  { %727 = vmatmul.mubr.f32.vlgmr.msra.gmra.mrb[8].mxu1 %v651_v45 }
 0x2c9   :  { %v932_v47 = vpop.f32.mrb[16].mxu0 }
 0x2ca   :  { %v933_v48 = vpop.f32.mrb[17].mxu0 }
 0x2cb   :  { %v934_v50 = vadd.f32 %v933_v48, %v932_v47 }
 0x2cd   :  { %v739_v52 = vmul.f32 %v934_v50, %v770_v49 }
 0x2cf   :  { %v748_v53 = vadd.f32 %v771_v51, %v739_v52 }
 0x2d1   :  { %vm750_vm8 = vcmp.ge.f32.partialorder %v748_v53, 0.0  ;;  %v752_v54 = vmul.f32 0.1, %v748_v53  ;;  %v935_v55 = vpop.f32.mrb[8].mxu1 }
 0x2d2   :  { %v936_v56 = vpop.f32.mrb[9].mxu1 }
 0x2d3   :  { %v754_v57 = vsel %vm750_vm8, %v748_v53, %v752_v54  ;;  %v937_v58 = vadd.f32 %v936_v56, %v935_v55 }
 0x2d4   :  { %756 = vst [vmem:[%s1709_s11] sm:$0xff] %v754_v57 }
 0x2d5   :  { %v740_v59 = vmul.f32 %v937_v58, %v770_v49 }
 0x2d7   :  { %v749_v60 = vadd.f32 %v771_v51, %v740_v59 }
 0x2d9   :  { %vm751_vm9 = vcmp.ge.f32.partialorder %v749_v60, 0.0  ;;  %v753_v61 = vmul.f32 0.1, %v749_v60 }
 0x2db   :  { %v755_v62 = vsel %vm751_vm9, %v749_v60, %v753_v61 }
 0x2dc   :  { %757 = vst [vmem:[%s1709_s11 + $0x8] sm:$0xff] %v755_v62 }

</bundles_post_ra>
